<compile_context>
chip_gen: v5e
topology: v5e:2x2
jax: 0.10.0
libtpu: 0.0.40
codegen_flags: <defaults>
</compile_context>

<pallas_src>
import jax
import jax.numpy as jnp
from jax.experimental import pallas as pl
from jax.experimental.pallas import tpu as pltpu


def _embedding_gather_kernel(idx_ref, table_hbm, out_ref, copy_sems):
    # idx_ref:    (N_pad,) int32 token ids, scalar-prefetched into SMEM
    # table_hbm:  (V, E_pad) float32 embedding table, left in HBM (pl.ANY)
    # out_ref:    (TB, E_pad) float32 output tile in VMEM
    # copy_sems:  (TB,) DMA semaphores, one per gathered row
    tb = out_ref.shape[0]
    v = table_hbm.shape[0]
    base = pl.program_id(0) * tb

    # Issue all row-gather DMAs (HBM table row -> output tile row), then wait.
    # Clamp ids so a bad token id cannot trigger an out-of-bounds DMA
    # (PyTorch would raise; here we clamp — see note in wrapper).
    copies = []
    for j in range(tb):  # tb is static -> fully unrolled, DMAs overlap
        row = jnp.clip(idx_ref[base + j], 0, v - 1)
        cp = pltpu.make_async_copy(
            table_hbm.at[pl.ds(row, 1), :],
            out_ref.at[pl.ds(j, 1), :],
            copy_sems.at[j],
        )
        cp.start()
        copies.append(cp)
    for cp in copies:
        cp.wait()


def text_embedding(x, table, *, tokens_per_block=None):
    """x: (B, S) int token ids; table: (V, E) float32. Returns (B, S, E).

    Matches PyTorch nn.Embedding(vocab_size, embed_size)(x) for in-range ids.
    """
    b, s = x.shape
    v, e = table.shape
    n = b * s

    # --- token-axis tiling: TB rows per grid step (multiple of 8) ----------
    if tokens_per_block is None:
        tb = 128 if n >= 128 else 8
    else:
        tb = tokens_per_block
    n_pad = ((n + tb - 1) // tb) * tb

    idx_flat = x.reshape(-1).astype(jnp.int32)
    if n_pad != n:
        idx_flat = jnp.pad(idx_flat, (0, n_pad - n))  # padded ids gather row 0

    # --- lane-dense embed dim: pad E to a multiple of 128 only if needed ---
    e_pad = ((e + 127) // 128) * 128
    table_p = table if e_pad == e else jnp.pad(table, ((0, 0), (0, e_pad - e)))

    grid = (n_pad // tb,)

    out_pad = pl.pallas_call(
        _embedding_gather_kernel,
        out_shape=jax.ShapeDtypeStruct((n_pad, e_pad), table.dtype),
        grid_spec=pltpu.PrefetchScalarGridSpec(
            num_scalar_prefetch=1,           # idx_flat -> SMEM before the grid
            grid=grid,
            in_specs=[
                pl.BlockSpec(memory_space=pl.ANY),   # table stays in HBM
            ],
            out_specs=pl.BlockSpec((tb, e_pad), lambda i, idx: (i, 0)),
            scratch_shapes=[pltpu.SemaphoreType.DMA((tb,))],
        ),
        compiler_params=pltpu.CompilerParams(
            # Token blocks are independent -> shard across v7x's 2 TCs;
            # harmless on v5e/v6e. VMEM footprint is only the (tb, e_pad)
            # output double-buffer, so the default scoped-VMEM limit is fine
            # on all generations (table never enters VMEM).
            dimension_semantics=("parallel",),
        ),
    )(idx_flat, table_p)

    return out_pad[:n, :e].reshape(b, s, e)


if __name__ == "__main__":
    # Small shapes consistent with TextEmbedding(vocab_size, embed_size):
    vocab_size = 32
    embed_size = 32
    batch, seq = 2, 8

    key = jax.random.PRNGKey(0)
    k_tab, k_idx = jax.random.split(key)

    # Deterministic parameter init (stand-in for nn.Embedding.weight).
    table = jax.random.normal(k_tab, (vocab_size, embed_size), dtype=jnp.float32)
    # Integer token ids (the forward-pass input).
    x = jax.random.randint(k_idx, (batch, seq), 0, vocab_size, dtype=jnp.int32)

    out = text_embedding(x, table)
    out = jax.block_until_ready(out)

    # Sanity check against plain JAX gather (same semantics as nn.Embedding).
    ref = table[x]
    assert out.shape == (batch, seq, embed_size)
    assert jnp.allclose(out, ref, atol=1e-6), "mismatch vs reference gather"

    # TODO(synk): nn.Embedding's padding_idx / sparse-grad options are not
    # modeled (TextEmbedding does not use them); out-of-range ids are clamped
    # instead of raising.
    print("KERNEL_OK")
</pallas_src>

<mosaic_0001>
module attributes {stable_mosaic.version = 11 : i64} {
  func.func @_embedding_gather_kernel(%arg0: i32, %arg1: memref<16xi32, #tpu.memory_space<smem>>, %arg2: memref<32x128xf32, #tpu.memory_space<any>>, %arg3: memref<8x128xf32, #tpu.memory_space<vmem>>, %arg4: memref<8x!tpu.dma_semaphore, #tpu.memory_space<semaphore_mem>>) attributes {dimension_semantics = [#tpu.dimension_semantics<parallel>], iteration_bounds = array<i64: 2>, scalar_prefetch = 1 : i64, scratch_operands = 1 : i64, tpu.core_type = #tpu.core_type<tc>, window_params = [{}, {transform_indices = @transform_1, window_bounds = array<i64: 8, 128>}]} {
    %c8_i32 = arith.constant 8 : i32
    %0 = arith.muli %arg0, %c8_i32 : i32
    %c0_i32 = arith.constant 0 : i32
    %1 = arith.addi %0, %c0_i32 : i32
    %2 = arith.index_cast %1 : i32 to index
    %3 = memref.load %arg1[%2] : memref<16xi32, #tpu.memory_space<smem>>
    %c0_i32_0 = arith.constant 0 : i32
    %c31_i32 = arith.constant 31 : i32
    %4 = arith.maxsi %c0_i32_0, %3 : i32
    %5 = arith.minsi %c31_i32, %4 : i32
    %c0_i32_1 = arith.constant 0 : i32
    %c0_i32_2 = arith.constant 0 : i32
    %6 = tpu.memref_slice %arg2[%5, %c0_i32_2] : memref<32x128xf32, #tpu.memory_space<any>> -> memref<1x128xf32, #tpu.memory_space<any>>
    %c0_i32_3 = arith.constant 0 : i32
    %c0_i32_4 = arith.constant 0 : i32
    %7 = tpu.memref_slice %arg3[%c0_i32_3, %c0_i32_4] : memref<8x128xf32, #tpu.memory_space<vmem>> -> memref<1x128xf32, #tpu.memory_space<vmem>>
    %8 = tpu.memref_slice %arg4[%c0_i32_1] : memref<8x!tpu.dma_semaphore, #tpu.memory_space<semaphore_mem>> -> memref<1x!tpu.dma_semaphore, #tpu.memory_space<semaphore_mem>>
    %9 = tpu.memref_squeeze %8 : memref<1x!tpu.dma_semaphore, #tpu.memory_space<semaphore_mem>> -> memref<!tpu.dma_semaphore, #tpu.memory_space<semaphore_mem>>
    tpu.enqueue_dma source(%6 : memref<1x128xf32, #tpu.memory_space<any>>) target(%7 : memref<1x128xf32, #tpu.memory_space<vmem>>) target_semaphore(%9 : memref<!tpu.dma_semaphore, #tpu.memory_space<semaphore_mem>>)
    %c1_i32 = arith.constant 1 : i32
    %10 = arith.addi %0, %c1_i32 : i32
    %11 = arith.index_cast %10 : i32 to index
    %12 = memref.load %arg1[%11] : memref<16xi32, #tpu.memory_space<smem>>
    %c0_i32_5 = arith.constant 0 : i32
    %c31_i32_6 = arith.constant 31 : i32
    %13 = arith.maxsi %c0_i32_5, %12 : i32
    %14 = arith.minsi %c31_i32_6, %13 : i32
    %c1_i32_7 = arith.constant 1 : i32
    %c0_i32_8 = arith.constant 0 : i32
    %15 = tpu.memref_slice %arg2[%14, %c0_i32_8] : memref<32x128xf32, #tpu.memory_space<any>> -> memref<1x128xf32, #tpu.memory_space<any>>
    %c1_i32_9 = arith.constant 1 : i32
    %c0_i32_10 = arith.constant 0 : i32
    %16 = tpu.memref_slice %arg3[%c1_i32_9, %c0_i32_10] : memref<8x128xf32, #tpu.memory_space<vmem>> -> memref<1x128xf32, #tpu.memory_space<vmem>>
    %17 = tpu.memref_slice %arg4[%c1_i32_7] : memref<8x!tpu.dma_semaphore, #tpu.memory_space<semaphore_mem>> -> memref<1x!tpu.dma_semaphore, #tpu.memory_space<semaphore_mem>>
    %18 = tpu.memref_squeeze %17 : memref<1x!tpu.dma_semaphore, #tpu.memory_space<semaphore_mem>> -> memref<!tpu.dma_semaphore, #tpu.memory_space<semaphore_mem>>
    tpu.enqueue_dma source(%15 : memref<1x128xf32, #tpu.memory_space<any>>) target(%16 : memref<1x128xf32, #tpu.memory_space<vmem>>) target_semaphore(%18 : memref<!tpu.dma_semaphore, #tpu.memory_space<semaphore_mem>>)
    %c2_i32 = arith.constant 2 : i32
    %19 = arith.addi %0, %c2_i32 : i32
    %20 = arith.index_cast %19 : i32 to index
    %21 = memref.load %arg1[%20] : memref<16xi32, #tpu.memory_space<smem>>
    %c0_i32_11 = arith.constant 0 : i32
    %c31_i32_12 = arith.constant 31 : i32
    %22 = arith.maxsi %c0_i32_11, %21 : i32
    %23 = arith.minsi %c31_i32_12, %22 : i32
    %c2_i32_13 = arith.constant 2 : i32
    %c0_i32_14 = arith.constant 0 : i32
    %24 = tpu.memref_slice %arg2[%23, %c0_i32_14] : memref<32x128xf32, #tpu.memory_space<any>> -> memref<1x128xf32, #tpu.memory_space<any>>
    %c2_i32_15 = arith.constant 2 : i32
    %c0_i32_16 = arith.constant 0 : i32
    %25 = tpu.memref_slice %arg3[%c2_i32_15, %c0_i32_16] : memref<8x128xf32, #tpu.memory_space<vmem>> -> memref<1x128xf32, #tpu.memory_space<vmem>>
    %26 = tpu.memref_slice %arg4[%c2_i32_13] : memref<8x!tpu.dma_semaphore, #tpu.memory_space<semaphore_mem>> -> memref<1x!tpu.dma_semaphore, #tpu.memory_space<semaphore_mem>>
    %27 = tpu.memref_squeeze %26 : memref<1x!tpu.dma_semaphore, #tpu.memory_space<semaphore_mem>> -> memref<!tpu.dma_semaphore, #tpu.memory_space<semaphore_mem>>
    tpu.enqueue_dma source(%24 : memref<1x128xf32, #tpu.memory_space<any>>) target(%25 : memref<1x128xf32, #tpu.memory_space<vmem>>) target_semaphore(%27 : memref<!tpu.dma_semaphore, #tpu.memory_space<semaphore_mem>>)
    %c3_i32 = arith.constant 3 : i32
    %28 = arith.addi %0, %c3_i32 : i32
    %29 = arith.index_cast %28 : i32 to index
    %30 = memref.load %arg1[%29] : memref<16xi32, #tpu.memory_space<smem>>
    %c0_i32_17 = arith.constant 0 : i32
    %c31_i32_18 = arith.constant 31 : i32
    %31 = arith.maxsi %c0_i32_17, %30 : i32
    %32 = arith.minsi %c31_i32_18, %31 : i32
    %c3_i32_19 = arith.constant 3 : i32
    %c0_i32_20 = arith.constant 0 : i32
    %33 = tpu.memref_slice %arg2[%32, %c0_i32_20] : memref<32x128xf32, #tpu.memory_space<any>> -> memref<1x128xf32, #tpu.memory_space<any>>
    %c3_i32_21 = arith.constant 3 : i32
    %c0_i32_22 = arith.constant 0 : i32
    %34 = tpu.memref_slice %arg3[%c3_i32_21, %c0_i32_22] : memref<8x128xf32, #tpu.memory_space<vmem>> -> memref<1x128xf32, #tpu.memory_space<vmem>>
    %35 = tpu.memref_slice %arg4[%c3_i32_19] : memref<8x!tpu.dma_semaphore, #tpu.memory_space<semaphore_mem>> -> memref<1x!tpu.dma_semaphore, #tpu.memory_space<semaphore_mem>>
    %36 = tpu.memref_squeeze %35 : memref<1x!tpu.dma_semaphore, #tpu.memory_space<semaphore_mem>> -> memref<!tpu.dma_semaphore, #tpu.memory_space<semaphore_mem>>
    tpu.enqueue_dma source(%33 : memref<1x128xf32, #tpu.memory_space<any>>) target(%34 : memref<1x128xf32, #tpu.memory_space<vmem>>) target_semaphore(%36 : memref<!tpu.dma_semaphore, #tpu.memory_space<semaphore_mem>>)
    %c4_i32 = arith.constant 4 : i32
    %37 = arith.addi %0, %c4_i32 : i32
    %38 = arith.index_cast %37 : i32 to index
    %39 = memref.load %arg1[%38] : memref<16xi32, #tpu.memory_space<smem>>
    %c0_i32_23 = arith.constant 0 : i32
    %c31_i32_24 = arith.constant 31 : i32
    %40 = arith.maxsi %c0_i32_23, %39 : i32
    %41 = arith.minsi %c31_i32_24, %40 : i32
    %c4_i32_25 = arith.constant 4 : i32
    %c0_i32_26 = arith.constant 0 : i32
    %42 = tpu.memref_slice %arg2[%41, %c0_i32_26] : memref<32x128xf32, #tpu.memory_space<any>> -> memref<1x128xf32, #tpu.memory_space<any>>
    %c4_i32_27 = arith.constant 4 : i32
    %c0_i32_28 = arith.constant 0 : i32
    %43 = tpu.memref_slice %arg3[%c4_i32_27, %c0_i32_28] : memref<8x128xf32, #tpu.memory_space<vmem>> -> memref<1x128xf32, #tpu.memory_space<vmem>>
    %44 = tpu.memref_slice %arg4[%c4_i32_25] : memref<8x!tpu.dma_semaphore, #tpu.memory_space<semaphore_mem>> -> memref<1x!tpu.dma_semaphore, #tpu.memory_space<semaphore_mem>>
    %45 = tpu.memref_squeeze %44 : memref<1x!tpu.dma_semaphore, #tpu.memory_space<semaphore_mem>> -> memref<!tpu.dma_semaphore, #tpu.memory_space<semaphore_mem>>
    tpu.enqueue_dma source(%42 : memref<1x128xf32, #tpu.memory_space<any>>) target(%43 : memref<1x128xf32, #tpu.memory_space<vmem>>) target_semaphore(%45 : memref<!tpu.dma_semaphore, #tpu.memory_space<semaphore_mem>>)
    %c5_i32 = arith.constant 5 : i32
    %46 = arith.addi %0, %c5_i32 : i32
    %47 = arith.index_cast %46 : i32 to index
    %48 = memref.load %arg1[%47] : memref<16xi32, #tpu.memory_space<smem>>
    %c0_i32_29 = arith.constant 0 : i32
    %c31_i32_30 = arith.constant 31 : i32
    %49 = arith.maxsi %c0_i32_29, %48 : i32
    %50 = arith.minsi %c31_i32_30, %49 : i32
    %c5_i32_31 = arith.constant 5 : i32
    %c0_i32_32 = arith.constant 0 : i32
    %51 = tpu.memref_slice %arg2[%50, %c0_i32_32] : memref<32x128xf32, #tpu.memory_space<any>> -> memref<1x128xf32, #tpu.memory_space<any>>
    %c5_i32_33 = arith.constant 5 : i32
    %c0_i32_34 = arith.constant 0 : i32
    %52 = tpu.memref_slice %arg3[%c5_i32_33, %c0_i32_34] : memref<8x128xf32, #tpu.memory_space<vmem>> -> memref<1x128xf32, #tpu.memory_space<vmem>>
    %53 = tpu.memref_slice %arg4[%c5_i32_31] : memref<8x!tpu.dma_semaphore, #tpu.memory_space<semaphore_mem>> -> memref<1x!tpu.dma_semaphore, #tpu.memory_space<semaphore_mem>>
    %54 = tpu.memref_squeeze %53 : memref<1x!tpu.dma_semaphore, #tpu.memory_space<semaphore_mem>> -> memref<!tpu.dma_semaphore, #tpu.memory_space<semaphore_mem>>
    tpu.enqueue_dma source(%51 : memref<1x128xf32, #tpu.memory_space<any>>) target(%52 : memref<1x128xf32, #tpu.memory_space<vmem>>) target_semaphore(%54 : memref<!tpu.dma_semaphore, #tpu.memory_space<semaphore_mem>>)
    %c6_i32 = arith.constant 6 : i32
    %55 = arith.addi %0, %c6_i32 : i32
    %56 = arith.index_cast %55 : i32 to index
    %57 = memref.load %arg1[%56] : memref<16xi32, #tpu.memory_space<smem>>
    %c0_i32_35 = arith.constant 0 : i32
    %c31_i32_36 = arith.constant 31 : i32
    %58 = arith.maxsi %c0_i32_35, %57 : i32
    %59 = arith.minsi %c31_i32_36, %58 : i32
    %c6_i32_37 = arith.constant 6 : i32
    %c0_i32_38 = arith.constant 0 : i32
    %60 = tpu.memref_slice %arg2[%59, %c0_i32_38] : memref<32x128xf32, #tpu.memory_space<any>> -> memref<1x128xf32, #tpu.memory_space<any>>
    %c6_i32_39 = arith.constant 6 : i32
    %c0_i32_40 = arith.constant 0 : i32
    %61 = tpu.memref_slice %arg3[%c6_i32_39, %c0_i32_40] : memref<8x128xf32, #tpu.memory_space<vmem>> -> memref<1x128xf32, #tpu.memory_space<vmem>>
    %62 = tpu.memref_slice %arg4[%c6_i32_37] : memref<8x!tpu.dma_semaphore, #tpu.memory_space<semaphore_mem>> -> memref<1x!tpu.dma_semaphore, #tpu.memory_space<semaphore_mem>>
    %63 = tpu.memref_squeeze %62 : memref<1x!tpu.dma_semaphore, #tpu.memory_space<semaphore_mem>> -> memref<!tpu.dma_semaphore, #tpu.memory_space<semaphore_mem>>
    tpu.enqueue_dma source(%60 : memref<1x128xf32, #tpu.memory_space<any>>) target(%61 : memref<1x128xf32, #tpu.memory_space<vmem>>) target_semaphore(%63 : memref<!tpu.dma_semaphore, #tpu.memory_space<semaphore_mem>>)
    %c7_i32 = arith.constant 7 : i32
    %64 = arith.addi %0, %c7_i32 : i32
    %65 = arith.index_cast %64 : i32 to index
    %66 = memref.load %arg1[%65] : memref<16xi32, #tpu.memory_space<smem>>
    %c0_i32_41 = arith.constant 0 : i32
    %c31_i32_42 = arith.constant 31 : i32
    %67 = arith.maxsi %c0_i32_41, %66 : i32
    %68 = arith.minsi %c31_i32_42, %67 : i32
    %c7_i32_43 = arith.constant 7 : i32
    %c0_i32_44 = arith.constant 0 : i32
    %69 = tpu.memref_slice %arg2[%68, %c0_i32_44] : memref<32x128xf32, #tpu.memory_space<any>> -> memref<1x128xf32, #tpu.memory_space<any>>
    %c7_i32_45 = arith.constant 7 : i32
    %c0_i32_46 = arith.constant 0 : i32
    %70 = tpu.memref_slice %arg3[%c7_i32_45, %c0_i32_46] : memref<8x128xf32, #tpu.memory_space<vmem>> -> memref<1x128xf32, #tpu.memory_space<vmem>>
    %71 = tpu.memref_slice %arg4[%c7_i32_43] : memref<8x!tpu.dma_semaphore, #tpu.memory_space<semaphore_mem>> -> memref<1x!tpu.dma_semaphore, #tpu.memory_space<semaphore_mem>>
    %72 = tpu.memref_squeeze %71 : memref<1x!tpu.dma_semaphore, #tpu.memory_space<semaphore_mem>> -> memref<!tpu.dma_semaphore, #tpu.memory_space<semaphore_mem>>
    tpu.enqueue_dma source(%69 : memref<1x128xf32, #tpu.memory_space<any>>) target(%70 : memref<1x128xf32, #tpu.memory_space<vmem>>) target_semaphore(%72 : memref<!tpu.dma_semaphore, #tpu.memory_space<semaphore_mem>>)
    %c0_i32_47 = arith.constant 0 : i32
    %c0_i32_48 = arith.constant 0 : i32
    %73 = tpu.memref_slice %arg2[%5, %c0_i32_48] : memref<32x128xf32, #tpu.memory_space<any>> -> memref<1x128xf32, #tpu.memory_space<any>>
    %c0_i32_49 = arith.constant 0 : i32
    %c0_i32_50 = arith.constant 0 : i32
    %74 = tpu.memref_slice %arg3[%c0_i32_49, %c0_i32_50] : memref<8x128xf32, #tpu.memory_space<vmem>> -> memref<1x128xf32, #tpu.memory_space<vmem>>
    %75 = tpu.memref_slice %arg4[%c0_i32_47] : memref<8x!tpu.dma_semaphore, #tpu.memory_space<semaphore_mem>> -> memref<1x!tpu.dma_semaphore, #tpu.memory_space<semaphore_mem>>
    %76 = tpu.memref_squeeze %75 : memref<1x!tpu.dma_semaphore, #tpu.memory_space<semaphore_mem>> -> memref<!tpu.dma_semaphore, #tpu.memory_space<semaphore_mem>>
    tpu.wait_dma2 semaphore(%76 : memref<!tpu.dma_semaphore, #tpu.memory_space<semaphore_mem>>) src(%73 : memref<1x128xf32, #tpu.memory_space<any>>) dst(%74 : memref<1x128xf32, #tpu.memory_space<vmem>>)
    %c1_i32_51 = arith.constant 1 : i32
    %c0_i32_52 = arith.constant 0 : i32
    %77 = tpu.memref_slice %arg2[%14, %c0_i32_52] : memref<32x128xf32, #tpu.memory_space<any>> -> memref<1x128xf32, #tpu.memory_space<any>>
    %c1_i32_53 = arith.constant 1 : i32
    %c0_i32_54 = arith.constant 0 : i32
    %78 = tpu.memref_slice %arg3[%c1_i32_53, %c0_i32_54] : memref<8x128xf32, #tpu.memory_space<vmem>> -> memref<1x128xf32, #tpu.memory_space<vmem>>
    %79 = tpu.memref_slice %arg4[%c1_i32_51] : memref<8x!tpu.dma_semaphore, #tpu.memory_space<semaphore_mem>> -> memref<1x!tpu.dma_semaphore, #tpu.memory_space<semaphore_mem>>
    %80 = tpu.memref_squeeze %79 : memref<1x!tpu.dma_semaphore, #tpu.memory_space<semaphore_mem>> -> memref<!tpu.dma_semaphore, #tpu.memory_space<semaphore_mem>>
    tpu.wait_dma2 semaphore(%80 : memref<!tpu.dma_semaphore, #tpu.memory_space<semaphore_mem>>) src(%77 : memref<1x128xf32, #tpu.memory_space<any>>) dst(%78 : memref<1x128xf32, #tpu.memory_space<vmem>>)
    %c2_i32_55 = arith.constant 2 : i32
    %c0_i32_56 = arith.constant 0 : i32
    %81 = tpu.memref_slice %arg2[%23, %c0_i32_56] : memref<32x128xf32, #tpu.memory_space<any>> -> memref<1x128xf32, #tpu.memory_space<any>>
    %c2_i32_57 = arith.constant 2 : i32
    %c0_i32_58 = arith.constant 0 : i32
    %82 = tpu.memref_slice %arg3[%c2_i32_57, %c0_i32_58] : memref<8x128xf32, #tpu.memory_space<vmem>> -> memref<1x128xf32, #tpu.memory_space<vmem>>
    %83 = tpu.memref_slice %arg4[%c2_i32_55] : memref<8x!tpu.dma_semaphore, #tpu.memory_space<semaphore_mem>> -> memref<1x!tpu.dma_semaphore, #tpu.memory_space<semaphore_mem>>
    %84 = tpu.memref_squeeze %83 : memref<1x!tpu.dma_semaphore, #tpu.memory_space<semaphore_mem>> -> memref<!tpu.dma_semaphore, #tpu.memory_space<semaphore_mem>>
    tpu.wait_dma2 semaphore(%84 : memref<!tpu.dma_semaphore, #tpu.memory_space<semaphore_mem>>) src(%81 : memref<1x128xf32, #tpu.memory_space<any>>) dst(%82 : memref<1x128xf32, #tpu.memory_space<vmem>>)
    %c3_i32_59 = arith.constant 3 : i32
    %c0_i32_60 = arith.constant 0 : i32
    %85 = tpu.memref_slice %arg2[%32, %c0_i32_60] : memref<32x128xf32, #tpu.memory_space<any>> -> memref<1x128xf32, #tpu.memory_space<any>>
    %c3_i32_61 = arith.constant 3 : i32
    %c0_i32_62 = arith.constant 0 : i32
    %86 = tpu.memref_slice %arg3[%c3_i32_61, %c0_i32_62] : memref<8x128xf32, #tpu.memory_space<vmem>> -> memref<1x128xf32, #tpu.memory_space<vmem>>
    %87 = tpu.memref_slice %arg4[%c3_i32_59] : memref<8x!tpu.dma_semaphore, #tpu.memory_space<semaphore_mem>> -> memref<1x!tpu.dma_semaphore, #tpu.memory_space<semaphore_mem>>
    %88 = tpu.memref_squeeze %87 : memref<1x!tpu.dma_semaphore, #tpu.memory_space<semaphore_mem>> -> memref<!tpu.dma_semaphore, #tpu.memory_space<semaphore_mem>>
    tpu.wait_dma2 semaphore(%88 : memref<!tpu.dma_semaphore, #tpu.memory_space<semaphore_mem>>) src(%85 : memref<1x128xf32, #tpu.memory_space<any>>) dst(%86 : memref<1x128xf32, #tpu.memory_space<vmem>>)
    %c4_i32_63 = arith.constant 4 : i32
    %c0_i32_64 = arith.constant 0 : i32
    %89 = tpu.memref_slice %arg2[%41, %c0_i32_64] : memref<32x128xf32, #tpu.memory_space<any>> -> memref<1x128xf32, #tpu.memory_space<any>>
    %c4_i32_65 = arith.constant 4 : i32
    %c0_i32_66 = arith.constant 0 : i32
    %90 = tpu.memref_slice %arg3[%c4_i32_65, %c0_i32_66] : memref<8x128xf32, #tpu.memory_space<vmem>> -> memref<1x128xf32, #tpu.memory_space<vmem>>
    %91 = tpu.memref_slice %arg4[%c4_i32_63] : memref<8x!tpu.dma_semaphore, #tpu.memory_space<semaphore_mem>> -> memref<1x!tpu.dma_semaphore, #tpu.memory_space<semaphore_mem>>
    %92 = tpu.memref_squeeze %91 : memref<1x!tpu.dma_semaphore, #tpu.memory_space<semaphore_mem>> -> memref<!tpu.dma_semaphore, #tpu.memory_space<semaphore_mem>>
    tpu.wait_dma2 semaphore(%92 : memref<!tpu.dma_semaphore, #tpu.memory_space<semaphore_mem>>) src(%89 : memref<1x128xf32, #tpu.memory_space<any>>) dst(%90 : memref<1x128xf32, #tpu.memory_space<vmem>>)
    %c5_i32_67 = arith.constant 5 : i32
    %c0_i32_68 = arith.constant 0 : i32
    %93 = tpu.memref_slice %arg2[%50, %c0_i32_68] : memref<32x128xf32, #tpu.memory_space<any>> -> memref<1x128xf32, #tpu.memory_space<any>>
    %c5_i32_69 = arith.constant 5 : i32
    %c0_i32_70 = arith.constant 0 : i32
    %94 = tpu.memref_slice %arg3[%c5_i32_69, %c0_i32_70] : memref<8x128xf32, #tpu.memory_space<vmem>> -> memref<1x128xf32, #tpu.memory_space<vmem>>
    %95 = tpu.memref_slice %arg4[%c5_i32_67] : memref<8x!tpu.dma_semaphore, #tpu.memory_space<semaphore_mem>> -> memref<1x!tpu.dma_semaphore, #tpu.memory_space<semaphore_mem>>
    %96 = tpu.memref_squeeze %95 : memref<1x!tpu.dma_semaphore, #tpu.memory_space<semaphore_mem>> -> memref<!tpu.dma_semaphore, #tpu.memory_space<semaphore_mem>>
    tpu.wait_dma2 semaphore(%96 : memref<!tpu.dma_semaphore, #tpu.memory_space<semaphore_mem>>) src(%93 : memref<1x128xf32, #tpu.memory_space<any>>) dst(%94 : memref<1x128xf32, #tpu.memory_space<vmem>>)
    %c6_i32_71 = arith.constant 6 : i32
    %c0_i32_72 = arith.constant 0 : i32
    %97 = tpu.memref_slice %arg2[%59, %c0_i32_72] : memref<32x128xf32, #tpu.memory_space<any>> -> memref<1x128xf32, #tpu.memory_space<any>>
    %c6_i32_73 = arith.constant 6 : i32
    %c0_i32_74 = arith.constant 0 : i32
    %98 = tpu.memref_slice %arg3[%c6_i32_73, %c0_i32_74] : memref<8x128xf32, #tpu.memory_space<vmem>> -> memref<1x128xf32, #tpu.memory_space<vmem>>
    %99 = tpu.memref_slice %arg4[%c6_i32_71] : memref<8x!tpu.dma_semaphore, #tpu.memory_space<semaphore_mem>> -> memref<1x!tpu.dma_semaphore, #tpu.memory_space<semaphore_mem>>
    %100 = tpu.memref_squeeze %99 : memref<1x!tpu.dma_semaphore, #tpu.memory_space<semaphore_mem>> -> memref<!tpu.dma_semaphore, #tpu.memory_space<semaphore_mem>>
    tpu.wait_dma2 semaphore(%100 : memref<!tpu.dma_semaphore, #tpu.memory_space<semaphore_mem>>) src(%97 : memref<1x128xf32, #tpu.memory_space<any>>) dst(%98 : memref<1x128xf32, #tpu.memory_space<vmem>>)
    %c7_i32_75 = arith.constant 7 : i32
    %c0_i32_76 = arith.constant 0 : i32
    %101 = tpu.memref_slice %arg2[%68, %c0_i32_76] : memref<32x128xf32, #tpu.memory_space<any>> -> memref<1x128xf32, #tpu.memory_space<any>>
    %c7_i32_77 = arith.constant 7 : i32
    %c0_i32_78 = arith.constant 0 : i32
    %102 = tpu.memref_slice %arg3[%c7_i32_77, %c0_i32_78] : memref<8x128xf32, #tpu.memory_space<vmem>> -> memref<1x128xf32, #tpu.memory_space<vmem>>
    %103 = tpu.memref_slice %arg4[%c7_i32_75] : memref<8x!tpu.dma_semaphore, #tpu.memory_space<semaphore_mem>> -> memref<1x!tpu.dma_semaphore, #tpu.memory_space<semaphore_mem>>
    %104 = tpu.memref_squeeze %103 : memref<1x!tpu.dma_semaphore, #tpu.memory_space<semaphore_mem>> -> memref<!tpu.dma_semaphore, #tpu.memory_space<semaphore_mem>>
    tpu.wait_dma2 semaphore(%104 : memref<!tpu.dma_semaphore, #tpu.memory_space<semaphore_mem>>) src(%101 : memref<1x128xf32, #tpu.memory_space<any>>) dst(%102 : memref<1x128xf32, #tpu.memory_space<vmem>>)
    return
  }
  func.func @transform_1(%arg0: i32, %arg1: memref<16xi32, #tpu.memory_space<smem>>) -> (i32, i32) {
    %c0_i32 = arith.constant 0 : i32
    %c0_i32_0 = arith.constant 0 : i32
    return %arg0, %c0_i32 : i32, i32
  }
}

</mosaic_0001>

<bundles_post_ra>
// kernel: tpu_custom_call.1
= control target key start
LH: loop header
LB: loop body
LE: loop exit
PB: predicated region body
PF: predicated region fallthrough
CT: control target
= control target key end

     0   :  { %s839_s12 = smov [#allocation4]   ;;  %s1177_s0 = inlined_call_operand.hbm [shape: s32[16], index: 0, kind: input, shape index: {}]   ;;  %s1178_s1 = inlined_call_operand.hbm [shape: f32[32,128], index: 1, kind: input, shape index: {}]   ;;  %s1179_s2 = inlined_call_operand.hbm [shape: f32[16,128], index: 2, kind: output, shape index: {}]  }
   0x1   :  { %s8_s11 = sshll.u32 %s1177_s0, 4  ;;  %s9_s11 = int_to_ptr.hbm [resolvable:$true] %s8_s11 }
   0x2   :  { %11 = dma.hbm_to_smem %s9_s11, 16, %s839_s12, [#allocation3] }
   0x3   :  { %789 = dma.done.wait [#allocation3], 16 }
   0x4   :  { %790 = vsyncadd [#allocation3], 4294967280 }
   0x5   :  { %14 = sfence }
   0x6   :  { %15 = vsyncpa [#allocation6], 0 }
   0x7   :  { %17 = vsyncpa [#allocation6 + $0x1], 0  ;;  %s858_s13 = smov 0   ;;  %s860_s14 = smov 0  }
   0x8   :  { %s862_s15 = smov 0  }
   0x9 LB: > { %s369_s0 = sadd.s32 4294967295, %s837_s15   ;;  %s875_s16 = sadd.s32 1, %s837_s15   ;;  %s837_s15 = sphi %s862_s15, %s1185_s15   ;;  %s833_s14 = sphi %s860_s14, %s1184_s14   ;;  %s829_s13 = sphi %s858_s13, %s1183_s13  }
   0xa   : > { %s26_s17 = ssub.s32 %s837_s15, %s875_s16  ;;  %s29_s18 = sadd.s32 1, %s833_s14 }
   0xb   : > { %p27_p0 = scmp.eq.s32.totalorder %s26_s17, 0  ;;  %p370_p1 = scmp.ne.s32.totalorder %s26_s17, 0 }
   0xc   : > { %p33_p2 = scmp.eq.s32.totalorder %s837_s15, 1  ;;  %p38_p3 = scmp.ne.s32.totalorder %s833_s14, %s829_s13 }
   0xd   : > { %s884_s19 = scalar_select %p27_p0, %s833_s14, %s29_s18  }
   0xe   : > { %p886_p4 = por %p370_p1, %p33_p2  ;;  %p39_p5 = scmp.eq.s32.totalorder %s369_s0, 1 }
   0xf   : > { %p484_p6 = scmp.lt.s32.totalorder %s837_s15, 2  ;;  %s53_s22 = sand.u32 1, %s833_s14  }
  0x10   : > { %p891_p7 = por %p39_p5, %p38_p3  ;;  %s372_s23 = sshll.u32 %s53_s22, 3 }
  0x11   : > { %s899_s24 = sshll.u32 %s837_s15, 3  ;;  %s907_s29 = scalar_lea.vmem [#allocation5], %s372_s23 }
  0x12   : > { %s445_s25 = scalar_select %p484_p6, [#allocation4], [#allocation25] }
  0x13   : > { %s446_s26 = scalar_select %p484_p6, %s899_s24, 0 }
  0x14   : > { %s76_s27 = sadd.s32 1, %s899_s24  ;;  %s83_s30 = scalar_lea.vmem %s907_s29, 1 [#allocation5] }
  0x15   : > { %s57_s28 = sld [smem:[%s445_s25 + %s446_s26]]  ;;  %s1187_s27 = smov (!%p484_p6, %s76_s27), 0 }
  0x16   : > { %s448_s3 = scalar_select %p484_p6, [#allocation4], [#allocation26] }
  0x17   : > { %s72_s4 = sshll.u32 %s907_s29, 4  ;;  %s915_s5 = sshll.u32 %s83_s30, 4  ;;  %s926_s4 = int_to_ptr.vmem [resolvable:$true] %s72_s4  ;;  %s95_s5 = int_to_ptr.vmem [resolvable:$true] %s915_s5 }
  0x18   : > { %s917_s6 = sld [smem:[%s448_s3 + %s1187_s27]]  ;;  %s98_s7 = sadd.s32 2, %s899_s24 }
  0x19   : > { %s451_s8 = scalar_select %p484_p6, [#allocation4], [#allocation27] }
  0x1a   : > { %s1189_s7 = smov (!%p484_p6, %s98_s7), 0  ;;  %s105_s17 = scalar_lea.vmem %s907_s29, 2 [#allocation5] }
  0x1b   : > { %p58_p8 = scmp.gt.s32.totalorder %s57_s28, 0  ;;  %p374_p9 = scmp.lt.s32.totalorder %s57_s28, 31 }
  0x1c   : > { %s924_s9 = sld [smem:[%s451_s8 + %s1189_s7]]  ;;  %s940_s27 = scalar_lea.hbm %s1178_s1, 32 }
  0x1d   : > { %s1191_s28 = smov (!%p58_p8, %s57_s28), 0 }
  0x1e   : > { %s1193_s28 = smov (!%p374_p9, %s1191_s28), 31  ;;  %p78_p10 = scmp.gt.s32.totalorder %s917_s6, 0 }
  0x1f   : > { %s62_s12 = scalar_lea.hbm %s1178_s1, %s1193_s28  ;;  %p379_p11 = scmp.lt.s32.totalorder %s917_s6, 31 }
  0x20   : > { %s70_s0 = sshll.u32 %s62_s12, 4  ;;  %s71_s0 = int_to_ptr.hbm [resolvable:$true] %s70_s0 }
  0x21   : > { %s523_s18 = sshra.s32 %s71_s0, 4  ;;  %s524_s18 = int_to_ptr.hbm [resolvable:$true] %s523_s18 }
  0x22   : > { %s525_s23 = scalar_lea.hbm %s524_s18, 1  ;;  %p530_p1 = scmp.lt.s32.totalorder %s524_s18, %s1178_s1 }
  0x23   : > { %p526_p12 = scmp.ne.s32.totalorder %s524_s18, %s525_s23  ;;  %p531_p2 = scmp.lt.s32.totalorder %s940_s27, %s525_s23 }
  0x25   : > { %p527_p13 = pnand %p526_p12, %p484_p6  ;;  %p532_p3 = por %p531_p2, %p530_p1 }
  0x27   : > { %p528_p0 = pneg %p527_p13 }
  0x29   : > { %p533_p5 = pnand %p532_p3, %p528_p0 }
  0x2b   : > { %536 = shalt.err (!%p533_p5)  }
  0x2c   : > { %447 = dma.hbm_to_vmem [thread:$0]  (%p484_p6), %s71_s0, 16, %s926_s4, [#allocation2] }
  0x2d   : > { %s79_s28 = scalar_select %p78_p10, %s917_s6, 0 }
  0x2e   : > { %p100_p8 = scmp.gt.s32.totalorder %s924_s9, 0  ;;  %s953_s7 = sshll.u32 %s105_s17, 4  ;;  %s117_s7 = int_to_ptr.vmem [resolvable:$true] %s953_s7 }
  0x2f   : > { %s1195_s28 = smov (!%p379_p11, %s79_s28), 31  ;;  %p384_p9 = scmp.lt.s32.totalorder %s924_s9, 31 }
  0x30   : > { %s101_s8 = scalar_select %p100_p8, %s924_s9, 0 }
  0x31   : > { %s82_s12 = scalar_lea.hbm %s1178_s1, %s1195_s28 }
  0x32   : > { %s92_s18 = sshll.u32 %s82_s12, 4  ;;  %s93_s18 = int_to_ptr.hbm [resolvable:$true] %s92_s18 }
  0x33   : > { %s551_s23 = sshra.s32 %s93_s18, 4  ;;  %s552_s23 = int_to_ptr.hbm [resolvable:$true] %s551_s23 }
  0x34   : > { %s553_s0 = scalar_lea.hbm %s552_s23, 1  ;;  %p558_p11 = scmp.lt.s32.totalorder %s552_s23, %s1178_s1 }
  0x35   : > { %p554_p10 = scmp.ne.s32.totalorder %s552_s23, %s553_s0  ;;  %p559_p0 = scmp.lt.s32.totalorder %s940_s27, %s553_s0 }
  0x37   : > { %p555_p12 = pnand %p554_p10, %p484_p6  ;;  %p560_p1 = por %p559_p0, %p558_p11 }
  0x39   : > { %p556_p13 = pneg %p555_p12 }
  0x3b   : > { %p561_p2 = pnand %p560_p1, %p556_p13 }
  0x3d   : > { %564 = shalt.err (!%p561_p2)  }
  0x3e   : > { %450 = dma.hbm_to_vmem [thread:$0]  (%p484_p6), %s93_s18, 16, %s95_s5, [#allocation2 + $0x1] }
  0x3f   : > { %s1197_s8 = smov (!%p384_p9, %s101_s8), 31  ;;  %s120_s28 = sadd.s32 3, %s899_s24 }
  0x40   : > { %s454_s25 = scalar_select %p484_p6, [#allocation4], [#allocation28] }
  0x41   : > { %s104_s3 = scalar_lea.hbm %s1178_s1, %s1197_s8  ;;  %s127_s11 = scalar_lea.vmem %s907_s29, 3 [#allocation5] }
  0x42   : > { %s114_s10 = sshll.u32 %s104_s3, 4  ;;  %s142_s12 = sadd.s32 4, %s899_s24  ;;  %s115_s10 = int_to_ptr.hbm [resolvable:$true] %s114_s10 }
  0x43   : > { %s579_s23 = sshra.s32 %s115_s10, 4  ;;  %s580_s23 = int_to_ptr.hbm [resolvable:$true] %s579_s23 }
  0x44   : > { %s581_s0 = scalar_lea.hbm %s580_s23, 1  ;;  %p586_p9 = scmp.lt.s32.totalorder %s580_s23, %s1178_s1 }
  0x45   : > { %p582_p3 = scmp.ne.s32.totalorder %s580_s23, %s581_s0  ;;  %p587_p10 = scmp.lt.s32.totalorder %s940_s27, %s581_s0 }
  0x47   : > { %p583_p5 = pnand %p582_p3, %p484_p6  ;;  %p588_p12 = por %p587_p10, %p586_p9 }
  0x49   : > { %p584_p8 = pneg %p583_p5 }
  0x4b   : > { %p589_p13 = pnand %p588_p12, %p584_p8 }
  0x4d   : > { %592 = shalt.err (!%p589_p13)  }
  0x4e   : > { %453 = dma.hbm_to_vmem [thread:$0]  (%p484_p6), %s115_s10, 16, %s117_s7, [#allocation2 + $0x2] }
  0x4f   : > { %s1199_s28 = smov (!%p484_p6, %s120_s28), 0  ;;  %s149_s17 = scalar_lea.vmem %s907_s29, 4 [#allocation5] }
  0x50   : > { %s457_s8 = scalar_select %p484_p6, [#allocation4], [#allocation29] }
  0x51   : > { %s121_s18 = sld [smem:[%s454_s25 + %s1199_s28]]  ;;  %s1201_s12 = smov (!%p484_p6, %s142_s12), 0 }
  0x52   : > { %s1000_s6 = sshll.u32 %s127_s11, 4  ;;  %s164_s26 = sadd.s32 5, %s899_s24  ;;  %s139_s6 = int_to_ptr.vmem [resolvable:$true] %s1000_s6 }
  0x53   : > { %s1003_s30 = sld [smem:[%s457_s8 + %s1201_s12]]  ;;  %s1005_s3 = sshll.u32 %s149_s17, 4  ;;  %s161_s3 = int_to_ptr.vmem [resolvable:$true] %s1005_s3 }
  0x54   : > { %s460_s7 = scalar_select %p484_p6, [#allocation4], [#allocation30] }
  0x55   : > { %s1203_s26 = smov (!%p484_p6, %s164_s26), 0  ;;  %s171_s0 = scalar_lea.vmem %s907_s29, 5 [#allocation5] }
  0x56   : > { %s1012_s25 = sld [smem:[%s460_s7 + %s1203_s26]] }
  0x57   : > { %p122_p11 = scmp.gt.s32.totalorder %s121_s18, 0  ;;  %p389_p0 = scmp.lt.s32.totalorder %s121_s18, 31 }
  0x59   : > { %s1205_s18 = smov (!%p122_p11, %s121_s18), 0  ;;  %p144_p1 = scmp.gt.s32.totalorder %s1003_s30, 0 }
  0x5a   : > { %s1207_s18 = smov (!%p389_p0, %s1205_s18), 31  ;;  %p394_p2 = scmp.lt.s32.totalorder %s1003_s30, 31 }
  0x5b   : > { %s145_s28 = scalar_select %p144_p1, %s1003_s30, 0 }
  0x5c   : > { %s126_s12 = scalar_lea.hbm %s1178_s1, %s1207_s18  ;;  %p166_p3 = scmp.gt.s32.totalorder %s1012_s25, 0 }
  0x5d   : > { %s136_s23 = sshll.u32 %s126_s12, 4  ;;  %s137_s23 = int_to_ptr.hbm [resolvable:$true] %s136_s23 }
  0x5e   : > { %s607_s5 = sshra.s32 %s137_s23, 4  ;;  %s608_s5 = int_to_ptr.hbm [resolvable:$true] %s607_s5 }
  0x5f   : > { %s609_s9 = scalar_lea.hbm %s608_s5, 1  ;;  %p614_p10 = scmp.lt.s32.totalorder %s608_s5, %s1178_s1 }
  0x60   : > { %p610_p5 = scmp.ne.s32.totalorder %s608_s5, %s609_s9  ;;  %p615_p12 = scmp.lt.s32.totalorder %s940_s27, %s609_s9 }
  0x62   : > { %p611_p8 = pnand %p610_p5, %p484_p6  ;;  %p616_p13 = por %p615_p12, %p614_p10 }
  0x64   : > { %p612_p9 = pneg %p611_p8 }
  0x66   : > { %p617_p11 = pnand %p616_p13, %p612_p9 }
  0x68   : > { %620 = shalt.err (!%p617_p11)  }
  0x69   : > { %456 = dma.hbm_to_vmem [thread:$0]  (%p484_p6), %s137_s23, 16, %s139_s6, [#allocation2 + $0x3] }
  0x6a   : > { %s1209_s28 = smov (!%p394_p2, %s145_s28), 31  ;;  %p399_p0 = scmp.lt.s32.totalorder %s1012_s25, 31 }
  0x6b   : > { %s167_s18 = scalar_select %p166_p3, %s1012_s25, 0 }
  0x6c   : > { %s148_s10 = scalar_lea.hbm %s1178_s1, %s1209_s28  ;;  %s1040_s12 = sshll.u32 %s171_s0, 4  ;;  %s183_s12 = int_to_ptr.vmem [resolvable:$true] %s1040_s12 }
  0x6d   : > { %s158_s11 = sshll.u32 %s148_s10, 4  ;;  %s159_s11 = int_to_ptr.hbm [resolvable:$true] %s158_s11 }
  0x6e   : > { %s635_s5 = sshra.s32 %s159_s11, 4  ;;  %s636_s5 = int_to_ptr.hbm [resolvable:$true] %s635_s5 }
  0x6f   : > { %s637_s9 = scalar_lea.hbm %s636_s5, 1  ;;  %p642_p2 = scmp.lt.s32.totalorder %s636_s5, %s1178_s1 }
  0x70   : > { %p638_p1 = scmp.ne.s32.totalorder %s636_s5, %s637_s9  ;;  %p643_p3 = scmp.lt.s32.totalorder %s940_s27, %s637_s9 }
  0x72   : > { %p639_p5 = pnand %p638_p1, %p484_p6  ;;  %p644_p9 = por %p643_p3, %p642_p2 }
  0x74   : > { %p640_p8 = pneg %p639_p5 }
  0x76   : > { %p645_p10 = pnand %p644_p9, %p640_p8 }
  0x78   : > { %648 = shalt.err (!%p645_p10)  }
  0x79   : > { %459 = dma.hbm_to_vmem [thread:$0]  (%p484_p6), %s159_s11, 16, %s161_s3, [#allocation2 + $0x4] }
  0x7a   : > { %s1211_s18 = smov (!%p399_p0, %s167_s18), 31  ;;  %s186_s26 = sadd.s32 6, %s899_s24 }
  0x7b   : > { %s463_s28 = scalar_select %p484_p6, [#allocation4], [#allocation31] }
  0x7c   : > { %s170_s8 = scalar_lea.hbm %s1178_s1, %s1211_s18  ;;  %s208_s7 = sadd.s32 7, %s899_s24 }
  0x7d   : > { %s180_s17 = sshll.u32 %s170_s8, 4  ;;  %s181_s17 = int_to_ptr.hbm [resolvable:$true] %s180_s17 }
  0x7e   : > { %s663_s10 = sshra.s32 %s181_s17, 4  ;;  %s664_s10 = int_to_ptr.hbm [resolvable:$true] %s663_s10 }
  0x7f   : > { %s665_s5 = scalar_lea.hbm %s664_s10, 1  ;;  %p670_p0 = scmp.lt.s32.totalorder %s664_s10, %s1178_s1 }
  0x80   : > { %p666_p12 = scmp.ne.s32.totalorder %s664_s10, %s665_s5  ;;  %p671_p1 = scmp.lt.s32.totalorder %s940_s27, %s665_s5 }
  0x82   : > { %p667_p13 = pnand %p666_p12, %p484_p6  ;;  %p672_p5 = por %p671_p1, %p670_p0 }
  0x84   : > { %p668_p11 = pneg %p667_p13 }
  0x86   : > { %p673_p8 = pnand %p672_p5, %p668_p11 }
  0x88   : > { %676 = shalt.err (!%p673_p8)  }
  0x89   : > { %462 = dma.hbm_to_vmem [thread:$0]  (%p484_p6), %s181_s17, 16, %s183_s12, [#allocation2 + $0x5] }
  0x8a   : > { %s1213_s26 = smov (!%p484_p6, %s186_s26), 0  ;;  %s193_s9 = scalar_lea.vmem %s907_s29, 6 [#allocation5] }
  0x8b   : > { %s466_s18 = scalar_select %p484_p6, [#allocation4], [#allocation32] }
  0x8c   : > { %s187_s11 = sld [smem:[%s463_s28 + %s1213_s26]]  ;;  %s1215_s7 = smov (!%p484_p6, %s208_s7), 0 }
  0x8d   : > { %s209_s6 = sld [smem:[%s466_s18 + %s1215_s7]]  ;;  %s204_s30 = sshll.u32 %s193_s9, 4  ;;  %s205_s30 = int_to_ptr.vmem [resolvable:$true] %s204_s30 }
  0x8e   : > { %s215_s23 = scalar_lea.vmem %s907_s29, 7 [#allocation5] }
  0x8f   : > { %s1081_s26 = sshll.u32 %s215_s23, 4  ;;  %s227_s26 = int_to_ptr.vmem [resolvable:$true] %s1081_s26 }
  0x92   : > { %p188_p2 = scmp.gt.s32.totalorder %s187_s11, 0  ;;  %p404_p3 = scmp.lt.s32.totalorder %s187_s11, 31 }
  0x93   : > { %p210_p9 = scmp.gt.s32.totalorder %s209_s6, 0  ;;  %p409_p10 = scmp.lt.s32.totalorder %s209_s6, 31 }
  0x94   : > { %s1217_s11 = smov (!%p188_p2, %s187_s11), 0 }
  0x95   : > { %s1219_s11 = smov (!%p404_p3, %s1217_s11), 31 }
  0x96   : > { %s211_s12 = scalar_select %p210_p9, %s209_s6, 0 }
  0x97   : > { %s192_s17 = scalar_lea.hbm %s1178_s1, %s1219_s11 }
  0x98   : > { %s202_s28 = sshll.u32 %s192_s17, 4  ;;  %s203_s28 = int_to_ptr.hbm [resolvable:$true] %s202_s28 }
  0x99   : > { %s691_s7 = sshra.s32 %s203_s28, 4  ;;  %s692_s7 = int_to_ptr.hbm [resolvable:$true] %s691_s7 }
  0x9a   : > { %s693_s10 = scalar_lea.hbm %s692_s7, 1  ;;  %p698_p0 = scmp.lt.s32.totalorder %s692_s7, %s1178_s1 }
  0x9b   : > { %p694_p12 = scmp.ne.s32.totalorder %s692_s7, %s693_s10  ;;  %p699_p1 = scmp.lt.s32.totalorder %s940_s27, %s693_s10 }
  0x9d   : > { %p695_p13 = pnand %p694_p12, %p484_p6  ;;  %p700_p5 = por %p699_p1, %p698_p0 }
  0x9f   : > { %p696_p11 = pneg %p695_p13 }
  0xa1   : > { %p701_p8 = pnand %p700_p5, %p696_p11 }
  0xa3   : > { %704 = shalt.err (!%p701_p8)  }
  0xa4   : > { %465 = dma.hbm_to_vmem [thread:$0]  (%p484_p6), %s203_s28, 16, %s205_s30, [#allocation2 + $0x6] }
  0xa5   : > { %s1221_s12 = smov (!%p409_p10, %s211_s12), 31 }
  0xa6   : > { %s214_s18 = scalar_lea.hbm %s1178_s1, %s1221_s12 }
  0xa7   : > { %s224_s11 = sshll.u32 %s214_s18, 4  ;;  %s225_s11 = int_to_ptr.hbm [resolvable:$true] %s224_s11 }
  0xa8   : > { %s719_s9 = sshra.s32 %s225_s11, 4  ;;  %s720_s9 = int_to_ptr.hbm [resolvable:$true] %s719_s9 }
  0xa9   : > { %s721_s23 = scalar_lea.hbm %s720_s9, 1  ;;  %p726_p12 = scmp.lt.s32.totalorder %s720_s9, %s1178_s1 }
  0xaa   : > { %p722_p2 = scmp.ne.s32.totalorder %s720_s9, %s721_s23  ;;  %p727_p13 = scmp.lt.s32.totalorder %s940_s27, %s721_s23 }
  0xac   : > { %p723_p3 = pnand %p722_p2, %p484_p6  ;;  %p728_p10 = por %p727_p13, %p726_p12 }
  0xae   : > { %p724_p9 = pneg %p723_p3 }
  0xb0   : > { %p729_p11 = pnand %p728_p10, %p724_p9 }
  0xb2   : > { %732 = shalt.err (!%p729_p11)  }
  0xb3   : > { %468 = dma.hbm_to_vmem [thread:$0]  (%p484_p6), %s225_s11, 16, %s227_s26, [#allocation2 + $0x7] }
  0xb4   : > { %792 = dma.done.wait (%p484_p6), [#allocation2], 16 }
  0xb5   : > { %794 = vsyncadd (%p484_p6), [#allocation2], 4294967280 }
  0xb6   : > { %796 = dma.done.wait (%p484_p6), [#allocation2 + $0x1], 16 }
  0xb7   : > { %798 = vsyncadd (%p484_p6), [#allocation2 + $0x1], 4294967280 }
  0xb8   : > { %800 = dma.done.wait (%p484_p6), [#allocation2 + $0x2], 16 }
  0xb9   : > { %802 = vsyncadd (%p484_p6), [#allocation2 + $0x2], 4294967280 }
  0xba   : > { %804 = dma.done.wait (%p484_p6), [#allocation2 + $0x3], 16 }
  0xbb   : > { %806 = vsyncadd (%p484_p6), [#allocation2 + $0x3], 4294967280 }
  0xbc   : > { %808 = dma.done.wait (%p484_p6), [#allocation2 + $0x4], 16 }
  0xbd   : > { %810 = vsyncadd (%p484_p6), [#allocation2 + $0x4], 4294967280 }
  0xbe   : > { %812 = dma.done.wait (%p484_p6), [#allocation2 + $0x5], 16 }
  0xbf   : > { %814 = vsyncadd (%p484_p6), [#allocation2 + $0x5], 4294967280 }
  0xc0   : > { %816 = dma.done.wait (%p484_p6), [#allocation2 + $0x6], 16 }
  0xc1   : > { %818 = vsyncadd (%p484_p6), [#allocation2 + $0x6], 4294967280 }
  0xc2   : > { %820 = dma.done.wait (%p484_p6), [#allocation2 + $0x7], 16 }
  0xc3   : > { %822 = vsyncadd (%p484_p6), [#allocation2 + $0x7], 4294967280  ;;  %s258_s30 = scalar_lea.hbm %s1179_s2, %s899_s24  ;;  %p1144_p0 = pnand %p484_p6, %p886_p4 }
  0xc4   : > { %s262_s12 = sshll.u32 %s258_s30, 4  ;;  %p485_p1 = scmp.ge.s32.totalorder %s837_s15, 1  ;;  %s263_s12 = int_to_ptr.hbm [resolvable:$true] %s262_s12 }
  0xc5   : > { %s248_s28 = scalar_lea.sflag [#allocation6], %s53_s22  ;;  %p751_p5 = pneg %p1144_p0 }
  0xc6   : > { %s762_s26 = sshra.s32 %s263_s12, 4  ;;  %s769_s10 = scalar_lea.hbm %s1179_s2, 16  ;;  %s763_s26 = int_to_ptr.hbm [resolvable:$true] %s762_s26 }
  0xc7   : > { %s764_s7 = scalar_lea.hbm %s763_s26, 8  ;;  %p770_p4 = scmp.lt.s32.totalorder %s763_s26, %s1179_s2 }
  0xc8   : > { %p765_p8 = scmp.ne.s32.totalorder %s763_s26, %s764_s7  ;;  %p771_p6 = scmp.lt.s32.totalorder %s769_s10, %s764_s7 }
  0xca   : > { %p767_p2 = pnand %p765_p8, %p751_p5  ;;  %p772_p9 = por %p771_p6, %p770_p4 }
  0xcc   : > { %p768_p3 = pneg %p767_p2 }
  0xce   : > { %p773_p12 = pnand %p772_p9, %p768_p3 }
  0xd0   : > { %776 = shalt.err (!%p773_p12)
}
  0xd1   : > { %479 = dma.vmem_to_hbm [thread:$0]  (!%p1144_p0), %s926_s4, 128, %s263_s12, %s248_s28  }
  0xd2   : > { %s274_s22 = sand.u32 1, %s829_s13   ;;  %p481_p13 = pnand %p485_p1, %p891_p7 }
  0xd3   : > { %s275_s3 = scalar_lea.sflag [#allocation6], %s274_s22 }
  0xd4   : > { %p482_p10 = pneg %p481_p13 }
  0xd6   : > { %824 = dma.done.wait (%p482_p10), %s275_s3, 128  }
  0xd7   : > { %826 = vsyncadd (%p482_p10), %s275_s3, 4294967168  ;;  %p20_p11 = scmp.ge.s32.totalorder %s875_s16, 3   ;;  %s1183_s13 = smov %s833_s14 }
  0xd8   : > { %s1184_s14 = smov %s884_s19  ;;  %s1185_s15 = smov %s875_s16 }
  0xd9   :  { %22 = sbr.rel (!%p20_p11) target bundleno = 9 (0x9), region = 105 }
  0xde   :  { %281 = vsyncpa [#allocation6], 1 }
  0xdf   :  { %283 = vsyncpa [#allocation6 + $0x1], 1 }
  0xe0   :  { %284 = vsyncmov [#allocation2] }
  0xe3   :  { %s285_s15 = vpop.sfrf %284 }
  0xe4   :  { %p418_p7 = scmp.ne.s32.totalorder %s285_s15, 0 }
  0xe6   :  { %289 = shalt.err (%p418_p7)  }
  0xe7   :  { %291 = vsyncmov [#allocation2 + $0x1] }
  0xea   :  { %s292_s21 = vpop.sfrf %291 }
  0xeb   :  { %p419_p0 = scmp.ne.s32.totalorder %s292_s21, 0 }
  0xed   :  { %296 = shalt.err (%p419_p0)  }
  0xee   :  { %298 = vsyncmov [#allocation2 + $0x2] }
  0xf1   :  { %s299_s4 = vpop.sfrf %298 }
  0xf2   :  { %p420_p1 = scmp.ne.s32.totalorder %s299_s4, 0 }
  0xf4   :  { %303 = shalt.err (%p420_p1)  }
  0xf5   :  { %305 = vsyncmov [#allocation2 + $0x3] }
  0xf8   :  { %s306_s25 = vpop.sfrf %305 }
  0xf9   :  { %p421_p5 = scmp.ne.s32.totalorder %s306_s25, 0 }
  0xfb   :  { %310 = shalt.err (%p421_p5)  }
  0xfc   :  { %312 = vsyncmov [#allocation2 + $0x4] }
  0xff   :  { %s313_s16 = vpop.sfrf %312 }
 0x100   :  { %p422_p8 = scmp.ne.s32.totalorder %s313_s16, 0 }
 0x102   :  { %317 = shalt.err (%p422_p8)  }
 0x103   :  { %319 = vsyncmov [#allocation2 + $0x5] }
 0x106   :  { %s320_s1 = vpop.sfrf %319 }
 0x107   :  { %p423_p2 = scmp.ne.s32.totalorder %s320_s1, 0 }
 0x109   :  { %324 = shalt.err (%p423_p2)  }
 0x10a   :  { %326 = vsyncmov [#allocation2 + $0x6] }
 0x10d   :  { %s327_s2 = vpop.sfrf %326 }
 0x10e   :  { %p424_p3 = scmp.ne.s32.totalorder %s327_s2, 0 }
 0x110   :  { %331 = shalt.err (%p424_p3)  }
 0x111   :  { %333 = vsyncmov [#allocation2 + $0x7] }
 0x114   :  { %s334_s13 = vpop.sfrf %333 }
 0x115   :  { %p425_p4 = scmp.ne.s32.totalorder %s334_s13, 0 }
 0x117   :  { %338 = shalt.err (%p425_p4)  }

</bundles_post_ra>
